<compile_context>
chip_gen: v7x
topology: tpu7x:2x2x1
jax: 0.10.0
libtpu: 0.0.40
codegen_flags: <defaults>
</compile_context>

<pallas_src>
import functools

import jax
import jax.numpy as jnp
from jax.experimental import pallas as pl
from jax.experimental.pallas import tpu as pltpu


def _cdiv(a, b):
    return -(-a // b)


def _round_up(v, m):
    return ((v + m - 1) // m) * m


def _ce_uniform_kernel(x_ref, o_ref, m_ref, l_ref, s_ref, *,
                       n_id_classes, n_cls, tc, mask_c):
    """Per-row CE vs. the uniform distribution, streamed over class tiles."""
    ci = pl.program_id(1)
    last_ci = pl.num_programs(1) - 1

    @pl.when(ci == 0)
    def _init():
        m_ref[...] = jnp.full_like(m_ref, -jnp.inf)   # running row max
        l_ref[...] = jnp.zeros_like(l_ref)            # running sum exp(x - m)
        s_ref[...] = jnp.zeros_like(s_ref)            # running sum (x - m)

    x = x_ref[...].astype(jnp.float32)                # (tb, tc), f32 compute
    m_old = m_ref[...]
    l_old = l_ref[...]
    s_old = s_ref[...]
    cols_done = (ci * tc).astype(jnp.float32)         # full columns already seen

    def _step(valid):
        if valid is None:
            x_for_max = x
            keep = lambda v: v
        else:
            x_for_max = jnp.where(valid, x, -jnp.inf)
            keep = lambda v: jnp.where(valid, v, 0.0)
        m_new = jnp.maximum(m_old, jnp.max(x_for_max, axis=-1, keepdims=True))
        d = x - m_new
        e_sum = jnp.sum(keep(jnp.exp(d)), axis=-1, keepdims=True)
        d_sum = jnp.sum(keep(d), axis=-1, keepdims=True)
        alpha = jnp.exp(m_old - m_new)
        # Compensated running sum of (x_c - m): re-base the old sum when the
        # running max moves.  Guard the -inf initial max (0 * -inf = nan).
        shift = jnp.where(m_old > -jnp.inf, cols_done * (m_old - m_new), 0.0)
        return m_new, l_old * alpha + e_sum, s_old + shift + d_sum

    if mask_c:
        # Only the LAST class tile overhangs C; pay the iota/compare/where
        # masking there and run the cheap unmasked path on all full tiles.
        def _masked():
            col = jax.lax.broadcasted_iota(jnp.int32, x.shape, 1) + ci * tc
            return _step(col < n_cls)

        m_new, l_new, s_new = jax.lax.cond(ci == last_ci, _masked,
                                           lambda: _step(None))
    else:
        m_new, l_new, s_new = _step(None)

    m_ref[...] = m_new
    l_ref[...] = l_new
    s_ref[...] = s_new

    @pl.when(ci == last_ci)
    def _finalize():
        # sum_c log_softmax(x)_c = sum_c (x_c - lse)
        #                        = sum_c (x_c - m) - C * log(sum_c exp(x_c - m))
        o_ref[...] = (-1.0 / n_id_classes) * (
            s_ref[...] - n_cls * jnp.log(l_ref[...]))


def _tpu_vmem_and_cores():
    """Best-effort query of physical VMEM and TensorCores-per-chip."""
    vmem = None
    try:
        info = pltpu.get_tpu_info()
        v = int(getattr(info, "vmem_capacity_bytes", 0))
        vmem = v if v > 0 else None
    except Exception:
        vmem = None
    kind = ""
    try:
        kind = jax.devices()[0].device_kind.lower()
    except Exception:
        pass
    single_tc = ("v5" in kind) or ("v6" in kind)      # v5e/v6e: 1 TC per chip
    if vmem is None:
        # 128 MiB on v5e/v6e; be conservative (64 MiB, v7x) when unknown.
        vmem = (128 << 20) if single_tc else (64 << 20)
    cores = 1 if single_tc else 2
    return vmem, cores


def _choose_tiles(batch, n_cls, itemsize, vmem_bytes, n_cores):
    """Pick (tb, tc) for the input tile, generation-aware."""
    sub = max(8, 32 // itemsize)          # sublane granularity: 8 f32 / 16 bf16

    if vmem_bytes >= (100 << 20):         # v5e / v6e (128 MiB physical VMEM)
        per_buffer_budget = 16 << 20
        tc_cap = 4096
    else:                                 # v7x (64 MiB physical VMEM)
        per_buffer_budget = 10 << 20
        tc_cap = 2048

    # Class tile: full C if small; otherwise split into near-equal lane-dense
    # tiles so the last tile is never mostly padding (e.g. C=2100 -> 2x1152,
    # not 2048+52).
    if n_cls <= tc_cap:
        tc = n_cls
    else:
        n_ct = _cdiv(n_cls, tc_cap)
        tc = _round_up(_cdiv(n_cls, n_ct), 128)

    max_tb = max(sub, per_buffer_budget // max(tc * itemsize, 1))
    if max_tb >= 256:
        max_tb = min((max_tb // 128) * 128, 1024)
    else:
        max_tb = max((max_tb // sub) * sub, sub)

    batch_pad = _round_up(batch, sub)     # blocks may overhang the batch
    tb = int(min(max_tb, batch_pad))

    # Multi-TensorCore chips (v7x megacore): make sure the "parallel" batch
    # axis has at least 2 tiles so both cores get work.
    if n_cores >= 2 and batch >= 2 * sub and _cdiv(batch, tb) < 2:
        tb = int(_round_up(_cdiv(batch, 2), sub))
    return tb, tc


def ce_uniform(x, n_id_classes, reduction=True, *, block_b=None, block_c=None,
               input_buffers=2):
    """Pallas implementation of CE_uniform.forward."""
    batch, n_cls = x.shape
    itemsize = jnp.dtype(x.dtype).itemsize
    sub = max(8, 32 // itemsize)

    vmem_phys, n_cores = _tpu_vmem_and_cores()
    tb, tc = _choose_tiles(batch, n_cls, itemsize, vmem_phys, n_cores)
    if block_c is not None:
        tc = int(min(block_c, n_cls))     # never exceed the array's last dim
    if block_b is not None:
        tb = int(min(block_b, _round_up(batch, sub)))

    grid = (_cdiv(batch, tb), _cdiv(n_cls, tc))
    mask_c = (n_cls % tc) != 0

    if input_buffers != 2:
        # Deeper input pipeline (sweep 2 vs 3 on v7x / bf16 inputs).
        in_spec = pl.BlockSpec((tb, tc), lambda bi, ci: (bi, ci),
                               pipeline_mode=pl.Buffered(input_buffers))
    else:
        in_spec = pl.BlockSpec((tb, tc), lambda bi, ci: (bi, ci))

    # Scoped-VMEM budget: pipelined input tiles + output block + scratch,
    # with headroom, clamped under the physical capacity (hard cap for v7x).
    n_buf = max(2, int(input_buffers))
    in_bytes = n_buf * tb * tc * itemsize
    out_bytes = 2 * tb * 512              # (tb, 1) f32 block, lane-padded
    scr_bytes = 3 * tb * 512              # m / l / s running statistics
    vmem_limit = in_bytes + out_bytes + scr_bytes + (4 << 20)
    vmem_limit = int(min(max(vmem_limit, 16 << 20), (vmem_phys * 9) // 10))

    rows = pl.pallas_call(
        functools.partial(
            _ce_uniform_kernel,
            n_id_classes=n_id_classes,
            n_cls=n_cls,
            tc=tc,
            mask_c=mask_c,
        ),
        out_shape=jax.ShapeDtypeStruct((batch, 1), jnp.float32),
        grid=grid,
        in_specs=[in_spec],
        out_specs=pl.BlockSpec((tb, 1), lambda bi, ci: (bi, 0)),
        scratch_shapes=[pltpu.VMEM((tb, 1), jnp.float32) for _ in range(3)],
        compiler_params=pltpu.CompilerParams(
            dimension_semantics=("parallel", "arbitrary"),
            vmem_limit_bytes=vmem_limit,
        ),
    )(x)[:, 0]

    if reduction:
        return jnp.sum(rows) / batch      # scalar, like torch's 0-dim tensor
    return rows                           # (B,), like sum(axis=1) in torch


def _reference(x, n_id_classes, reduction):
    b = (1.0 / n_id_classes) * jax.nn.log_softmax(x.astype(jnp.float32), axis=1)
    if reduction:
        return -jnp.sum(b) / x.shape[0]
    return -jnp.sum(b, axis=1)


if __name__ == "__main__":
    # Test 1: shapes from the module's typical use (batch, n_id_classes).
    batch, n_id_classes = 8, 16
    x = jax.random.normal(jax.random.PRNGKey(0), (batch, n_id_classes),
                          dtype=jnp.float32)
    out_scalar = jax.block_until_ready(ce_uniform(x, n_id_classes, reduction=True))
    out_vec = jax.block_until_ready(ce_uniform(x, n_id_classes, reduction=False))
    assert jnp.allclose(out_scalar, _reference(x, n_id_classes, True),
                        rtol=1e-5, atol=1e-5)
    assert jnp.allclose(out_vec, _reference(x, n_id_classes, False),
                        rtol=1e-5, atol=1e-5)

    # Test 2: ragged batch + class tiling (online LSE, tail mask on last tile).
    batch2, n_cls2 = 10, 200
    x2 = jax.random.normal(jax.random.PRNGKey(1), (batch2, n_cls2),
                           dtype=jnp.float32)
    out2 = jax.block_until_ready(
        ce_uniform(x2, n_cls2, reduction=False, block_c=128))
    assert jnp.allclose(out2, _reference(x2, n_cls2, False),
                        rtol=1e-5, atol=1e-5)

    # Test 3: bf16 input (half the HBM read cost, upcast inside the kernel).
    x2_bf16 = x2.astype(jnp.bfloat16)
    out3 = jax.block_until_ready(
        ce_uniform(x2_bf16, n_cls2, reduction=True, block_c=128))
    ref3 = _reference(x2_bf16.astype(jnp.float32), n_cls2, True)
    assert jnp.allclose(out3, ref3, rtol=1e-4, atol=1e-4)

    # Test 4: streamed class tiles + compensated sum + last-tile-only masking.
    batch4, n_cls4 = 32, 2300
    x4 = jax.random.normal(jax.random.PRNGKey(2), (batch4, n_cls4),
                           dtype=jnp.float32)
    out4 = jax.block_until_ready(
        ce_uniform(x4, n_cls4, reduction=True, block_c=1024))
    assert jnp.allclose(out4, _reference(x4, n_cls4, True),
                        rtol=1e-4, atol=1e-4)

    print("KERNEL_OK")
</pallas_src>

<mosaic_0001>
module attributes {stable_mosaic.version = 11 : i64} {
  func.func @_ce_uniform_kernel(%arg0: i32, %arg1: i32, %arg2: memref<8x16xf32, #tpu.memory_space<vmem>>, %arg3: memref<8x1xf32, #tpu.memory_space<vmem>>, %arg4: memref<8x1xf32, #tpu.memory_space<vmem>>, %arg5: memref<8x1xf32, #tpu.memory_space<vmem>>, %arg6: memref<8x1xf32, #tpu.memory_space<vmem>>) attributes {dimension_semantics = [#tpu.dimension_semantics<parallel>, #tpu.dimension_semantics<arbitrary>], iteration_bounds = array<i64: 1, 1>, scalar_prefetch = 0 : i64, scratch_operands = 3 : i64, tpu.core_type = #tpu.core_type<tc>, window_params = [{transform_indices = @transform_0, window_bounds = array<i64: 8, 16>}, {transform_indices = @transform_1, window_bounds = array<i64: 8, 1>}]} {
    %c0_i32 = arith.constant 0 : i32
    %0 = arith.cmpi eq, %arg1, %c0_i32 : i32
    %1 = arith.extui %0 : i1 to i32
    %c0_i32_0 = arith.constant 0 : i32
    %2 = arith.cmpi ne, %1, %c0_i32_0 : i32
    scf.if %2 {
      %cst_20 = arith.constant 0xFF800000 : f32
      %38 = vector.broadcast %cst_20 : f32 to vector<8x1xf32>
      %c0_21 = arith.constant 0 : index
      %c0_22 = arith.constant 0 : index
      %39 = vector.load %arg4[%c0_21, %c0_22] : memref<8x1xf32, #tpu.memory_space<vmem>>, vector<8x1xf32>
      tpu.vector_store %arg4[%c0_21, %c0_22], %38 {strides = array<i32>} : memref<8x1xf32, #tpu.memory_space<vmem>>, vector<8x1xf32>,
      %cst_23 = arith.constant 0.000000e+00 : f32
      %40 = vector.broadcast %cst_23 : f32 to vector<8x1xf32>
      %c0_24 = arith.constant 0 : index
      %c0_25 = arith.constant 0 : index
      %41 = vector.load %arg5[%c0_24, %c0_25] : memref<8x1xf32, #tpu.memory_space<vmem>>, vector<8x1xf32>
      tpu.vector_store %arg5[%c0_24, %c0_25], %40 {strides = array<i32>} : memref<8x1xf32, #tpu.memory_space<vmem>>, vector<8x1xf32>,
      %cst_26 = arith.constant 0.000000e+00 : f32
      %42 = vector.broadcast %cst_26 : f32 to vector<8x1xf32>
      %c0_27 = arith.constant 0 : index
      %c0_28 = arith.constant 0 : index
      %43 = vector.load %arg6[%c0_27, %c0_28] : memref<8x1xf32, #tpu.memory_space<vmem>>, vector<8x1xf32>
      tpu.vector_store %arg6[%c0_27, %c0_28], %42 {strides = array<i32>} : memref<8x1xf32, #tpu.memory_space<vmem>>, vector<8x1xf32>,
    } else {
    }
    %c0 = arith.constant 0 : index
    %c0_1 = arith.constant 0 : index
    %3 = vector.load %arg2[%c0, %c0_1] : memref<8x16xf32, #tpu.memory_space<vmem>>, vector<8x16xf32>
    %c0_2 = arith.constant 0 : index
    %c0_3 = arith.constant 0 : index
    %4 = vector.load %arg4[%c0_2, %c0_3] : memref<8x1xf32, #tpu.memory_space<vmem>>, vector<8x1xf32>
    %c0_4 = arith.constant 0 : index
    %c0_5 = arith.constant 0 : index
    %5 = vector.load %arg5[%c0_4, %c0_5] : memref<8x1xf32, #tpu.memory_space<vmem>>, vector<8x1xf32>
    %c0_6 = arith.constant 0 : index
    %c0_7 = arith.constant 0 : index
    %6 = vector.load %arg6[%c0_6, %c0_7] : memref<8x1xf32, #tpu.memory_space<vmem>>, vector<8x1xf32>
    %c16_i32 = arith.constant 16 : i32
    %7 = arith.muli %arg1, %c16_i32 : i32
    %8 = arith.sitofp %7 : i32 to f32
    %cst = arith.constant dense<0xFF800000> : vector<8xf32>
    %9 = vector.multi_reduction <maximumf>, %3, %cst [1] : vector<8x16xf32> to vector<8xf32>
    %10 = vector.shape_cast %9 : vector<8xf32> to vector<8x1xf32>
    %11 = arith.maximumf %4, %10 : vector<8x1xf32>
    %12 = vector.broadcast %11 : vector<8x1xf32> to vector<8x16xf32>
    %13 = arith.subf %3, %12 : vector<8x16xf32>
    %14 = math.exp %13 : vector<8x16xf32>
    %cst_8 = arith.constant dense<0.000000e+00> : vector<8xf32>
    %15 = vector.multi_reduction <add>, %14, %cst_8 [1] : vector<8x16xf32> to vector<8xf32>
    %16 = vector.shape_cast %15 : vector<8xf32> to vector<8x1xf32>
    %cst_9 = arith.constant dense<0.000000e+00> : vector<8xf32>
    %17 = vector.multi_reduction <add>, %13, %cst_9 [1] : vector<8x16xf32> to vector<8xf32>
    %18 = vector.shape_cast %17 : vector<8xf32> to vector<8x1xf32>
    %19 = arith.subf %4, %11 : vector<8x1xf32>
    %20 = math.exp %19 : vector<8x1xf32>
    %cst_10 = arith.constant 0xFF800000 : f32
    %21 = vector.broadcast %cst_10 : f32 to vector<8x1xf32>
    %22 = arith.cmpf ogt, %4, %21 : vector<8x1xf32>
    %23 = arith.subf %4, %11 : vector<8x1xf32>
    %24 = vector.broadcast %8 : f32 to vector<8x1xf32>
    %25 = arith.mulf %24, %23 : vector<8x1xf32>
    %cst_11 = arith.constant 0.000000e+00 : f32
    %26 = vector.broadcast %cst_11 : f32 to vector<8x1xf32>
    %27 = arith.select %22, %25, %26 : vector<8x1xi1>, vector<8x1xf32>
    %28 = arith.mulf %5, %20 : vector<8x1xf32>
    %29 = arith.addf %28, %16 : vector<8x1xf32>
    %30 = arith.addf %6, %27 : vector<8x1xf32>
    %31 = arith.addf %30, %18 : vector<8x1xf32>
    %c0_12 = arith.constant 0 : index
    %c0_13 = arith.constant 0 : index
    %32 = vector.load %arg4[%c0_12, %c0_13] : memref<8x1xf32, #tpu.memory_space<vmem>>, vector<8x1xf32>
    tpu.vector_store %arg4[%c0_12, %c0_13], %11 {strides = array<i32>} : memref<8x1xf32, #tpu.memory_space<vmem>>, vector<8x1xf32>,
    %c0_14 = arith.constant 0 : index
    %c0_15 = arith.constant 0 : index
    %33 = vector.load %arg5[%c0_14, %c0_15] : memref<8x1xf32, #tpu.memory_space<vmem>>, vector<8x1xf32>
    tpu.vector_store %arg5[%c0_14, %c0_15], %29 {strides = array<i32>} : memref<8x1xf32, #tpu.memory_space<vmem>>, vector<8x1xf32>,
    %c0_16 = arith.constant 0 : index
    %c0_17 = arith.constant 0 : index
    %34 = vector.load %arg6[%c0_16, %c0_17] : memref<8x1xf32, #tpu.memory_space<vmem>>, vector<8x1xf32>
    tpu.vector_store %arg6[%c0_16, %c0_17], %31 {strides = array<i32>} : memref<8x1xf32, #tpu.memory_space<vmem>>, vector<8x1xf32>,
    %c0_i32_18 = arith.constant 0 : i32
    %35 = arith.cmpi eq, %arg1, %c0_i32_18 : i32
    %36 = arith.extui %35 : i1 to i32
    %c0_i32_19 = arith.constant 0 : i32
    %37 = arith.cmpi ne, %36, %c0_i32_19 : i32
    scf.if %37 {
      %c0_20 = arith.constant 0 : index
      %c0_21 = arith.constant 0 : index
      %38 = vector.load %arg6[%c0_20, %c0_21] : memref<8x1xf32, #tpu.memory_space<vmem>>, vector<8x1xf32>
      %c0_22 = arith.constant 0 : index
      %c0_23 = arith.constant 0 : index
      %39 = vector.load %arg5[%c0_22, %c0_23] : memref<8x1xf32, #tpu.memory_space<vmem>>, vector<8x1xf32>
      %40 = math.log %39 : vector<8x1xf32>
      %cst_24 = arith.constant 1.600000e+01 : f32
      %41 = vector.broadcast %cst_24 : f32 to vector<8x1xf32>
      %42 = arith.mulf %41, %40 : vector<8x1xf32>
      %43 = arith.subf %38, %42 : vector<8x1xf32>
      %cst_25 = arith.constant -6.250000e-02 : f32
      %44 = vector.broadcast %cst_25 : f32 to vector<8x1xf32>
      %45 = arith.mulf %44, %43 : vector<8x1xf32>
      %c0_26 = arith.constant 0 : index
      %c0_27 = arith.constant 0 : index
      %46 = vector.load %arg3[%c0_26, %c0_27] : memref<8x1xf32, #tpu.memory_space<vmem>>, vector<8x1xf32>
      tpu.vector_store %arg3[%c0_26, %c0_27], %45 {strides = array<i32>} : memref<8x1xf32, #tpu.memory_space<vmem>>, vector<8x1xf32>,
    } else {
    }
    return
  }
  func.func @transform_0(%arg0: i32, %arg1: i32) -> (i32, i32) {
    %c0_i32 = arith.constant 0 : i32
    return %arg0, %arg1 : i32, i32
  }
  func.func @transform_1(%arg0: i32, %arg1: i32) -> (i32, i32) {
    %c0_i32 = arith.constant 0 : i32
    %c0_i32_0 = arith.constant 0 : i32
    return %arg0, %c0_i32 : i32, i32
  }
}

</mosaic_0001>

<bundles_post_ra>
// kernel: tpu_custom_call.1
= control target key start
LH: loop header
LB: loop body
LE: loop exit
PB: predicated region body
PF: predicated region fallthrough
CT: control target
= control target key end

     0   :  { %6 = vsyncpa [#allocation6], 0  ;;  %s119_s6 = smov [#allocation5]   ;;  %s158_s0 = inlined_call_operand.hbm [shape: f32[8,16], index: 0, kind: input, shape index: {}]   ;;  %s159_s1 = inlined_call_operand.vmem [shape: f32[8,1], index: 1, kind: output, shape index: {}]  }
   0x1   :  { %s13_s7 = sshll.u32 %s119_s6, 4  ;;  %s95_s10 = scalar_lea.hbm %s158_s0, 128  ;;  %s14_s7 = int_to_ptr.vmem [resolvable:$true] %s13_s7 }
   0x2   :  { %p96_p0 = scmp.ne.s32.totalorder %s158_s0, %s95_s10  ;;  %p99_p1 = scmp.lt.u32.totalorder %s95_s10, %s158_s0 }
   0x4   :  { %p101_p2 = pnand %p99_p1, %p96_p0 }
   0x6   :  { %104 = shalt.err (!%p101_p2)
}
   0x7   :  { %s105_s15 = scalar_lea.vmem %s14_s7, 128  ;;  %p110_p4 = scmp.lt.s32.totalorder %s14_s7, %s14_s7 }
   0x8   :  { %p106_p3 = scmp.ne.s32.totalorder %s14_s7, %s105_s15  ;;  %p111_p5 = scmp.lt.s32.totalorder %s105_s15, %s105_s15 }
   0xa   :  { %p112_p6 = por %p111_p5, %p110_p4 }
   0xc   :  { %p113_p7 = pnand %p112_p6, %p106_p3 }
   0xe   :  { %116 = shalt.err (!%p113_p7)
}
   0xf   :  { %16 = dma.hbm_to_vmem [thread:$0]  %s158_s0, 128, %s14_s7, [#allocation6]  }
  0x10   :  { %117 = dma.done.wait [#allocation6], 128  }
  0x11   :  { %118 = vsyncadd [#allocation6], 4294967168  ;;  %vm24_vm0 = vcmask 7168   ;;  %v120_v0 = vmov -inf   ;;  %vm34_vm1 = vcmask 130048   ;;  %v28_v1 = vld [vmem:[#allocation5] sm:$0xff] }
  0x12   :  { %25 = vst.msk [vmem:[#allocation2] sm:$0xff] %vm24_vm0, %v120_v0  ;;  %v35_v2 = vsel %vm34_vm1, %v28_v1, -inf  ;;  %v121_v3 = vmov 0.0   ;;  %v122_v4 = vmov 0  }
  0x13   :  { %36 = vmax.xlane.f32.xlu0 %v35_v2  ;;  %26 = vst.msk [vmem:[#allocation3] sm:$0xff] %vm24_vm0, %v121_v3  ;;  %27 = vst.msk [vmem:[#allocation4] sm:$0xff] %vm24_vm0, %v121_v3 }
  0x14   :  { %88 = vset.pattern.permute.xlu0 %v122_v4 }
  0x19   :  { %v29_v5 = vld [vmem:[#allocation2] sm:$0xff] }
  0x1a   :  { %v30_v17 = vld [vmem:[#allocation3] sm:$0xff]  ;;  %vm56_vm2 = vcmp.gt.f32.partialorder %v29_v5, -inf  ;;  %v31_v21 = vld [vmem:[#allocation4] sm:$0xff] }
  0xa0   :  { %v37_v6 = vpop.xlane.xlu0 %36 }
  0xa1   :  { %v38_v7 = vmax.f32 %v29_v5, %v37_v6 }
  0xa3   :  { %65 = vst.msk [vmem:[#allocation2] sm:$0xff] %vm24_vm0, %v38_v7  ;;  %41 = vperm.xlu0 %88, %v38_v7   ;;  %v53_v14 = vsub.f32 %v29_v5, %v38_v7 }
  0xa5   :  { %v54_v15 = vmul.f32 1.442695, %v53_v14  ;;  %v58_v18 = vmul.f32 0.0, %v53_v14 }
  0xa7   :  { %v59_v22 = vsel %vm56_vm2, %v58_v18, 0.0 }
  0xa8   :  { %v62_v24 = vadd.f32 %v59_v22, %v31_v21 }
 0x122   :  { %v42_v8 = vpop.permute.xlu0 %41 }
 0x123   :  { %v44_v9 = vsub.f32 %v28_v1, %v42_v8 }
 0x125   :  { %v45_v10 = vmul.f32 1.442695, %v44_v9  ;;  %v50_v13 = vsel %vm34_vm1, %v44_v9, 0.0 }
 0x127   :  { %89 = vpow2.f32 %v45_v10 }
 0x128   :  { %91 = vpow2.f32 %v54_v15 }
 0x131   :  { %v90_v11 = vpop.eup %89 }
 0x132   :  { %v47_v12 = vsel %vm34_vm1, %v90_v11, 0.0  ;;  %v92_v16 = vpop.eup %91 }
 0x133   :  { %48 = vadd.xlane.f32.xlu1 %v47_v12  ;;  %v60_v19 = vmul.f32 %v92_v16, %v30_v17 }
 0x137   :  { %51 = vadd.xlane.f32.xlu1 %v50_v13 }
 0x1c0   :  { %v49_v20 = vpop.xlane.xlu1 %48 }
 0x1c1   :  { %v61_v23 = vadd.f32 %v60_v19, %v49_v20 }
 0x1c3   :  { %66 = vst.msk [vmem:[#allocation3] sm:$0xff] %vm24_vm0, %v61_v23 }
 0x1c4   :  { %v52_v25 = vpop.xlane.xlu1 %51 }
 0x1c5   :  { %v63_v26 = vadd.f32 %v62_v24, %v52_v25 }
 0x1c7   :  { %67 = vst.msk [vmem:[#allocation4] sm:$0xff] %vm24_vm0, %v63_v26 }
 0x1ca   :  { %v72_v27 = vld [vmem:[#allocation3] sm:$0xff] }
 0x1cb   :  { %93 = vlog2.f32 %v72_v27 }
 0x1ce   :  { %v71_v31 = vld [vmem:[#allocation4] sm:$0xff] }
 0x1d5   :  { %v94_v28 = vpop.eup %93 }
 0x1d6   :  { %v74_v29 = vmul.f32 0.6931472, %v94_v28 }
 0x1d8   :  { %v75_v30 = vmul.f32 16.0, %v74_v29 }
 0x1da   :  { %v76_v32 = vsub.f32 %v71_v31, %v75_v30 }
 0x1dc   :  { %v77_v33 = vmul.f32 -0.0625, %v76_v32 }
 0x1de   :  { %78 = vst.msk [vmem:[%s159_s1] sm:$0xff] %vm24_vm0, %v77_v33 }
 0x1df   :  { %83 = vsyncpa [#allocation6], 1 }

</bundles_post_ra>
